<compile_context>
chip_gen: v6e
topology: v6e:2x2x1
jax: 0.10.0
libtpu: 0.0.40
codegen_flags: <defaults>
</compile_context>

<pallas_src>
import functools

import jax
import jax.numpy as jnp
from jax.experimental import pallas as pl
from jax.experimental.pallas import tpu as pltpu

LANE = 128            # lane (last-dim) tile
BF16_ROWS = 16        # bf16 packs 2 rows per sublane -> batch tiles x16
DEFAULT_BLOCK_H = 512 # hidden-dim tile (multiple of 128)


def _round_up(n, m):
    return ((n + m - 1) // m) * m


def mlp_kernel(x_ref, w1_ref, b1_ref, w2_ref, b2_ref, o_ref, acc_ref):
    """One (batch-tile i, hidden-tile h) grid step of relu(x@W1+b1)@W2 + b2.

    The hidden axis (last grid axis, "arbitrary") is a reduction: each step
    computes a TH-wide slice of the hidden layer (ReLU is elementwise along H,
    so per-tile ReLU is exact) and accumulates its contribution into the
    (TB, Op) f32 accumulator; bias-add + store happen on the last hidden step.
    """
    h_idx = pl.program_id(1)

    @pl.when(h_idx == 0)
    def _init():
        acc_ref[...] = jnp.zeros_like(acc_ref)

    # hidden slice: relu(x @ W1[:, h*TH:(h+1)*TH] + b1)   (bf16 in, f32 acc)
    h = jnp.dot(x_ref[...], w1_ref[...], preferred_element_type=jnp.float32)
    h = jnp.maximum(h + b1_ref[...], 0.0)          # (1, TH) broadcasts over batch
    # its contribution to the output: h @ W2[h*TH:(h+1)*TH, :]
    acc_ref[...] += jnp.dot(h.astype(jnp.bfloat16), w2_ref[...],
                            preferred_element_type=jnp.float32)

    @pl.when(h_idx == pl.num_programs(1) - 1)
    def _finalize():
        o_ref[...] = (acc_ref[...] + b2_ref[...]).astype(o_ref.dtype)


def prepare_params(w1, b1, w2, b2, *, block_h=DEFAULT_BLOCK_H):
    """Pad + cast the Linear parameters ONCE (hoisted out of the per-call path).

    w1: (F, H)  (transpose of torch hidden.weight),  b1: (H,)
    w2: (H, O)  (transpose of torch predict.weight), b2: (O,)
    H and O are padded to lane tiles; zero padding is exact for Linear+ReLU and
    the padded output columns are sliced off by the caller.  F stays unpadded.
    """
    F, H = w1.shape
    H2, O = w2.shape
    assert H2 == H
    TH = min(block_h, _round_up(H, LANE))
    Hp = _round_up(H, TH)
    Op = _round_up(O, LANE)

    w1p = jnp.zeros((F, Hp), jnp.bfloat16).at[:, :H].set(w1.astype(jnp.bfloat16))
    b1p = jnp.zeros((1, Hp), jnp.float32).at[:, :H].set(
        jnp.reshape(b1, (1, H)).astype(jnp.float32))
    w2p = jnp.zeros((Hp, Op), jnp.bfloat16).at[:H, :O].set(w2.astype(jnp.bfloat16))
    b2p = jnp.zeros((1, Op), jnp.float32).at[:, :O].set(
        jnp.reshape(b2, (1, O)).astype(jnp.float32))
    return w1p, b1p, w2p, b2p


@functools.partial(
    jax.jit,
    static_argnames=("n_output", "block_b", "block_h",
                     "single_buffer_weights", "vmem_budget_bytes"))
def net_forward(x, w1p, b1p, w2p, b2p, *, n_output,
                block_b=256, block_h=DEFAULT_BLOCK_H,
                single_buffer_weights=None,
                vmem_budget_bytes=48 * 1024 * 1024):
    """Pallas forward pass of Net on pre-padded params (see prepare_params)."""
    B, F = x.shape
    F2, Hp = w1p.shape
    Hp2, Op = w2p.shape
    assert F2 == F and Hp2 == Hp and Op >= n_output

    # ---- hidden-dim tiling (bounds weight / hidden VMEM regardless of H) ----
    TH = min(block_h, Hp)
    assert Hp % TH == 0, "prepare_params and net_forward must use the same block_h"
    nh = Hp // TH

    # Single-buffer grid-invariant weight blocks (only meaningful when they are
    # NOT streamed along the hidden axis); auto-enable only when the default
    # double-buffered residency is actually large.
    per_buf_weight_bytes = F * TH * 2 + TH * 4 + TH * Op * 2 + Op * 4
    if single_buffer_weights is None:
        single_buffer_weights = (nh == 1) and per_buf_weight_bytes > (8 << 20)
    single_buffer_weights = bool(single_buffer_weights) and nh == 1
    wbufs = 1 if single_buffer_weights else 2

    # ---- batch tiling ----
    TB = min(block_b, _round_up(B, BF16_ROWS))
    # Prefer >= 2 batch steps so dimension_semantics=("parallel", ...) can split
    # the batch across v7x's two TensorCores (harmless extra step on 1-TC chips).
    if B > BF16_ROWS and _round_up(B, TB) == TB:
        TB = _round_up((B + 1) // 2, BF16_ROWS)

    def vmem_estimate(tb):
        return (2 * tb * F * 2                  # x tiles (bf16, double-buffered)
                + wbufs * per_buf_weight_bytes  # W1 / b1 / W2 / b2 tiles
                + 2 * tb * Op * 4               # out tiles (double-buffered)
                + tb * Op * 4)                  # f32 accumulator scratch

    # Shrink TB until the pipeline working set fits the budget (v7x: 64 MiB phys).
    while TB > BF16_ROWS and vmem_estimate(TB) > vmem_budget_bytes:
        TB = max(BF16_ROWS, _round_up(TB // 2, BF16_ROWS))

    Bp = _round_up(B, TB)
    nb = Bp // TB

    # Batch pad + bf16 cast of activations outside the kernel (halves x DMA,
    # removes the per-step VPU cast).  Padded rows are sliced off below.
    xp = jnp.zeros((Bp, F), jnp.bfloat16).at[:B, :].set(x.astype(jnp.bfloat16))

    def wspec(shape, index_map):
        if single_buffer_weights:
            return pl.BlockSpec(shape, index_map, pipeline_mode=pl.Buffered(1))
        return pl.BlockSpec(shape, index_map)

    flops = 2 * Bp * F * Hp + 2 * Bp * Hp * Op
    bytes_accessed = (Bp * F * 2 + F * Hp * 2 + Hp * 4
                      + Hp * Op * 2 + Op * 4 + Bp * Op * 4)
    vmem_limit = int(min(max(2 * vmem_estimate(TB), 32 << 20), 96 << 20))

    out_p = pl.pallas_call(
        mlp_kernel,
        out_shape=jax.ShapeDtypeStruct((Bp, Op), jnp.float32),
        grid_spec=pltpu.PrefetchScalarGridSpec(
            num_scalar_prefetch=0,
            grid=(nb, nh),
            in_specs=[
                # x tile walks the batch; constant along h -> fetched once per i
                pl.BlockSpec((TB, F), lambda i, h: (i, 0)),
                wspec((F, TH), lambda i, h: (0, h)),    # W1 column block
                wspec((1, TH), lambda i, h: (0, h)),    # b1
                wspec((TH, Op), lambda i, h: (h, 0)),   # W2 row block
                wspec((1, Op), lambda i, h: (0, 0)),    # b2 (grid-invariant)
            ],
            out_specs=pl.BlockSpec((TB, Op), lambda i, h: (i, 0)),
            scratch_shapes=[pltpu.VMEM((TB, Op), jnp.float32)],
        ),
        compiler_params=pltpu.CompilerParams(
            dimension_semantics=("parallel", "arbitrary"),
            vmem_limit_bytes=vmem_limit,
        ),
        cost_estimate=pl.CostEstimate(
            flops=flops, transcendentals=0, bytes_accessed=bytes_accessed),
    )(xp, w1p, b1p, w2p, b2p)

    return out_p[:B, :n_output]


if __name__ == "__main__":
    # Net(n_feature=16, n_hidden=32, n_output=8), batch=4
    n_feature, n_hidden, n_output = 16, 32, 8
    batch = 4

    key = jax.random.PRNGKey(0)
    kx, k1, k2, k3, k4 = jax.random.split(key, 5)

    x = jax.random.normal(kx, (batch, n_feature), dtype=jnp.float32)
    # Deterministic init (torch.nn.Linear params, stored transposed as (in, out)).
    w1 = jax.random.normal(k1, (n_feature, n_hidden), dtype=jnp.float32) * 0.1
    b1 = jax.random.normal(k2, (n_hidden,), dtype=jnp.float32) * 0.1
    w2 = jax.random.normal(k3, (n_hidden, n_output), dtype=jnp.float32) * 0.1
    b2 = jax.random.normal(k4, (n_output,), dtype=jnp.float32) * 0.1

    # Pad / cast the weights ONCE (hoisted out of the per-call path).
    params = prepare_params(w1, b1, w2, b2)

    out = net_forward(x, *params, n_output=n_output)
    jax.block_until_ready(out)
    assert out.shape == (batch, n_output)

    # Reference 1: identical mixed precision (bf16 matmul inputs, f32 accumulate).
    xb = x.astype(jnp.bfloat16)
    h_ref = jnp.maximum(
        jnp.dot(xb, w1.astype(jnp.bfloat16), preferred_element_type=jnp.float32)
        + b1[None, :], 0.0)
    ref_bf16 = jnp.dot(h_ref.astype(jnp.bfloat16), w2.astype(jnp.bfloat16),
                       preferred_element_type=jnp.float32) + b2[None, :]
    assert jnp.allclose(out, ref_bf16, atol=1e-4, rtol=1e-4), \
        "mismatch vs bf16-matmul reference"

    # Reference 2: full-f32 reference of the original module (loose tolerance,
    # accounts only for the bf16 matmul-input rounding).
    ref_f32 = jnp.maximum(x @ w1 + b1[None, :], 0.0) @ w2 + b2[None, :]
    assert jnp.allclose(out, ref_f32, atol=5e-2, rtol=5e-2), \
        "mismatch vs f32 reference"

    print("KERNEL_OK")
</pallas_src>

<mosaic_0001>
module attributes {stable_mosaic.version = 11 : i64} {
  func.func @mlp_kernel(%arg0: i32, %arg1: i32, %arg2: memref<16x16xbf16, #tpu.memory_space<vmem>>, %arg3: memref<16x128xbf16, #tpu.memory_space<vmem>>, %arg4: memref<1x128xf32, #tpu.memory_space<vmem>>, %arg5: memref<128x128xbf16, #tpu.memory_space<vmem>>, %arg6: memref<1x128xf32, #tpu.memory_space<vmem>>, %arg7: memref<16x128xf32, #tpu.memory_space<vmem>>, %arg8: memref<16x128xf32, #tpu.memory_space<vmem>>) attributes {dimension_semantics = [#tpu.dimension_semantics<parallel>, #tpu.dimension_semantics<arbitrary>], iteration_bounds = array<i64: 1, 1>, scalar_prefetch = 0 : i64, scratch_operands = 1 : i64, tpu.core_type = #tpu.core_type<tc>, window_params = [{transform_indices = @transform_0, window_bounds = array<i64: 16, 16>}, {transform_indices = @transform_1, window_bounds = array<i64: 16, 128>}, {transform_indices = @transform_2, window_bounds = array<i64: 1, 128>}, {transform_indices = @transform_3, window_bounds = array<i64: 128, 128>}, {pipeline_mode = #tpu.pipeline_mode<synchronous>, transform_indices = @transform_4, window_bounds = array<i64: 1, 128>}, {transform_indices = @transform_5, window_bounds = array<i64: 16, 128>}]} {
    %c0_i32 = arith.constant 0 : i32
    %0 = arith.cmpi eq, %arg1, %c0_i32 : i32
    %1 = arith.extui %0 : i1 to i32
    %c0_i32_0 = arith.constant 0 : i32
    %2 = arith.cmpi ne, %1, %c0_i32_0 : i32
    scf.if %2 {
      %cst_16 = arith.constant 0.000000e+00 : f32
      %20 = vector.broadcast %cst_16 : f32 to vector<16x128xf32>
      %c0_17 = arith.constant 0 : index
      %c0_18 = arith.constant 0 : index
      %21 = vector.load %arg8[%c0_17, %c0_18] : memref<16x128xf32, #tpu.memory_space<vmem>>, vector<16x128xf32>
      tpu.vector_store %arg8[%c0_17, %c0_18], %20 {strides = array<i32>} : memref<16x128xf32, #tpu.memory_space<vmem>>, vector<16x128xf32>,
    } else {
    }
    %c0 = arith.constant 0 : index
    %c0_1 = arith.constant 0 : index
    %3 = vector.load %arg2[%c0, %c0_1] : memref<16x16xbf16, #tpu.memory_space<vmem>>, vector<16x16xbf16>
    %c0_2 = arith.constant 0 : index
    %c0_3 = arith.constant 0 : index
    %4 = vector.load %arg3[%c0_2, %c0_3] : memref<16x128xbf16, #tpu.memory_space<vmem>>, vector<16x128xbf16>
    %cst = arith.constant dense<0.000000e+00> : vector<16x128xf32>
    %5 = tpu.matmul %3, %4, %cst {dimension_numbers = #tpu.dot_dimension_numbers<[1], [0], [0], [1], [0, 0, 1, 1], [], []>} : vector<16x16xbf16>, vector<16x128xbf16>, vector<16x128xf32> -> vector<16x128xf32>
    %c0_4 = arith.constant 0 : index
    %c0_5 = arith.constant 0 : index
    %6 = vector.load %arg4[%c0_4, %c0_5] : memref<1x128xf32, #tpu.memory_space<vmem>>, vector<1x128xf32>
    %7 = vector.broadcast %6 : vector<1x128xf32> to vector<16x128xf32>
    %8 = arith.addf %5, %7 : vector<16x128xf32>
    %cst_6 = arith.constant 0.000000e+00 : f32
    %9 = vector.broadcast %cst_6 : f32 to vector<16x128xf32>
    %10 = arith.maximumf %8, %9 : vector<16x128xf32>
    %c0_7 = arith.constant 0 : index
    %c0_8 = arith.constant 0 : index
    %11 = vector.load %arg8[%c0_7, %c0_8] : memref<16x128xf32, #tpu.memory_space<vmem>>, vector<16x128xf32>
    %12 = arith.truncf %10 : vector<16x128xf32> to vector<16x128xbf16>
    %c0_9 = arith.constant 0 : index
    %c0_10 = arith.constant 0 : index
    %13 = vector.load %arg5[%c0_9, %c0_10] : memref<128x128xbf16, #tpu.memory_space<vmem>>, vector<128x128xbf16>
    %cst_11 = arith.constant dense<0.000000e+00> : vector<16x128xf32>
    %14 = tpu.matmul %12, %13, %cst_11 {dimension_numbers = #tpu.dot_dimension_numbers<[1], [0], [0], [1], [0, 0, 1, 1], [], []>} : vector<16x128xbf16>, vector<128x128xbf16>, vector<16x128xf32> -> vector<16x128xf32>
    %15 = arith.addf %11, %14 : vector<16x128xf32>
    %c0_12 = arith.constant 0 : index
    %c0_13 = arith.constant 0 : index
    %16 = vector.load %arg8[%c0_12, %c0_13] : memref<16x128xf32, #tpu.memory_space<vmem>>, vector<16x128xf32>
    tpu.vector_store %arg8[%c0_12, %c0_13], %15 {strides = array<i32>} : memref<16x128xf32, #tpu.memory_space<vmem>>, vector<16x128xf32>,
    %c0_i32_14 = arith.constant 0 : i32
    %17 = arith.cmpi eq, %arg1, %c0_i32_14 : i32
    %18 = arith.extui %17 : i1 to i32
    %c0_i32_15 = arith.constant 0 : i32
    %19 = arith.cmpi ne, %18, %c0_i32_15 : i32
    scf.if %19 {
      %c0_16 = arith.constant 0 : index
      %c0_17 = arith.constant 0 : index
      %20 = vector.load %arg8[%c0_16, %c0_17] : memref<16x128xf32, #tpu.memory_space<vmem>>, vector<16x128xf32>
      %c0_18 = arith.constant 0 : index
      %c0_19 = arith.constant 0 : index
      %21 = vector.load %arg6[%c0_18, %c0_19] : memref<1x128xf32, #tpu.memory_space<vmem>>, vector<1x128xf32>
      %22 = vector.broadcast %21 : vector<1x128xf32> to vector<16x128xf32>
      %23 = arith.addf %20, %22 : vector<16x128xf32>
      %c0_20 = arith.constant 0 : index
      %c0_21 = arith.constant 0 : index
      %24 = vector.load %arg7[%c0_20, %c0_21] : memref<16x128xf32, #tpu.memory_space<vmem>>, vector<16x128xf32>
      tpu.vector_store %arg7[%c0_20, %c0_21], %23 {strides = array<i32>} : memref<16x128xf32, #tpu.memory_space<vmem>>, vector<16x128xf32>,
    } else {
    }
    return
  }
  func.func @transform_0(%arg0: i32, %arg1: i32) -> (i32, i32) {
    %c0_i32 = arith.constant 0 : i32
    %c0_i32_0 = arith.constant 0 : i32
    return %arg0, %c0_i32 : i32, i32
  }
  func.func @transform_1(%arg0: i32, %arg1: i32) -> (i32, i32) {
    %c0_i32 = arith.constant 0 : i32
    %c0_i32_0 = arith.constant 0 : i32
    return %c0_i32, %arg1 : i32, i32
  }
  func.func @transform_2(%arg0: i32, %arg1: i32) -> (i32, i32) {
    %c0_i32 = arith.constant 0 : i32
    %c0_i32_0 = arith.constant 0 : i32
    return %c0_i32, %arg1 : i32, i32
  }
  func.func @transform_3(%arg0: i32, %arg1: i32) -> (i32, i32) {
    %c0_i32 = arith.constant 0 : i32
    %c0_i32_0 = arith.constant 0 : i32
    return %arg1, %c0_i32 : i32, i32
  }
  func.func @transform_4(%arg0: i32, %arg1: i32) -> (i32, i32) {
    %c0_i32 = arith.constant 0 : i32
    %c0_i32_0 = arith.constant 0 : i32
    %c0_i32_1 = arith.constant 0 : i32
    return %c0_i32, %c0_i32_0 : i32, i32
  }
  func.func @transform_5(%arg0: i32, %arg1: i32) -> (i32, i32) {
    %c0_i32 = arith.constant 0 : i32
    %c0_i32_0 = arith.constant 0 : i32
    return %arg0, %c0_i32 : i32, i32
  }
}

</mosaic_0001>

<bundles_post_ra>
// kernel: net_forward.1
= control target key start
LH: loop header
LB: loop body
LE: loop exit
PB: predicated region body
PF: predicated region fallthrough
CT: control target
= control target key end

     0   :  { %10 = vsyncpa [#allocation4], 0  ;;  %s330_s18 = smov [#allocation3]   ;;  %s386_s0 = inlined_call_operand.vmem [shape: bf16[16,16], index: 0, kind: input, shape index: {}]   ;;  %s387_s1 = inlined_call_operand.vmem [shape: bf16[16,128], index: 1, kind: input, shape index: {}]   ;;  %s388_s2 = inlined_call_operand.vmem [shape: f32[1,128], index: 2, kind: input, shape index: {}]   ;;  %s389_s3 = inlined_call_operand.hbm [shape: bf16[128,128], index: 3, kind: input, shape index: {}]   ;;  %s390_s4 = inlined_call_operand.vmem [shape: f32[1,128], index: 4, kind: input, shape index: {}]   ;;  %s391_s5 = inlined_call_operand.vmem [shape: f32[16,128], index: 5, kind: output, shape index: {}]  }
   0x1   :  { %s22_s19 = sshll.u32 %s330_s18, 4  ;;  %s23_s19 = int_to_ptr.vmem [resolvable:$true] %s22_s19 }
   0x2   :  { %s316_s20 = scalar_lea.vmem %s23_s19, 1024  ;;  %p321_p1 = scmp.lt.s32.totalorder %s23_s19, %s23_s19 }
   0x3   :  { %p317_p0 = scmp.ne.s32.totalorder %s23_s19, %s316_s20  ;;  %p322_p2 = scmp.lt.s32.totalorder %s316_s20, %s316_s20 }
   0x5   :  { %p323_p3 = por %p322_p2, %p321_p1 }
   0x7   :  { %p324_p4 = pnand %p323_p3, %p317_p0 }
   0x9   :  { %327 = shalt.err (!%p324_p4)
}
   0xa   :  { %s331_s21 = smov 64   ;;  %s332_s22 = smov 4  }
   0xb   :  { %28 = dma.hbm_to_vmem [thread:$0]  %s389_s3, 1024, %s23_s19, [#allocation4], %s331_s21, %s331_s21, %s332_s22  }
   0xc   :  { %328 = dma.done.wait [#allocation4], 1024  }
   0xd   :  { %329 = vsyncadd [#allocation4], 4294966272  ;;  %v333_v0 = vmov 0.0   ;;  %vm334_vm0 = vmmov 0   ;;  %v298_v1 = vld [vmem:[%s387_s1] sm:$0xff]   ;;  %vm63_vm1 = vcmask 130048  }
   0xe   :  { %267 = vmatprep.subr.bf16.mxu0 %v333_v0  ;;  %269 = vmatprep.mubr.msk.bf16.mxu0 %vm334_vm0, %v333_v0  ;;  %v299_v2 = vld [vmem:[%s386_s0] sm:$0xff]   ;;  %v300_v3 = vld [vmem:[#allocation3 + $0x38] sm:$0xff]   ;;  %v301_v4 = vld [vmem:[#allocation3 + $0x30] sm:$0xff]  }
   0xf   :  { %273 = vmatprep.subr.bf16.mxu1 %v333_v0  ;;  %289 = vmatprep.mubr.msk.bf16.mxu1 %vm334_vm0, %v333_v0  ;;  %v302_v5 = vld [vmem:[#allocation3 + $0x28] sm:$0xff]   ;;  %v303_v6 = vld [vmem:[#allocation3 + $0x20] sm:$0xff]   ;;  %v304_v7 = vld [vmem:[#allocation3 + $0x18] sm:$0xff]  }
  0x10   :  { %268 = vmatpush3.bf16.msra.mxu0 %v298_v1  ;;  %274 = vmatpush3.bf16.msra.mxu1 %v300_v3  ;;  %v305_v8 = vld [vmem:[#allocation3 + $0x10] sm:$0xff]   ;;  %v306_v9 = vld [vmem:[#allocation3 + $0x8] sm:$0xff]   ;;  %v307_v10 = vld [vmem:[#allocation3] sm:$0xff]  }
  0x11   :  { %275 = vmatprep.subr.bf16.mxu1 %v333_v0  ;;  %v243_v11 = vld [vmem:[%s388_s2] ss:$0 sm:$0xff] }
  0x12   :  { %v255_v21 = vld [vmem:[%s390_s4] ss:$0 sm:$0xff] }
  0x13   :  { %270 = vmatmul.mubr.msk.bf16.vlgmr.msra.gmra.mxu0 %vm63_vm1, %v299_v2 }
  0x14   :  { %276 = vmatpush3.bf16.msra.mxu1 %v301_v4 }
  0x15   :  { %277 = vmatprep.subr.bf16.mxu1 %v333_v0 }
  0x18   :  { %278 = vmatpush3.bf16.msra.mxu1 %v302_v5 }
  0x19   :  { %279 = vmatprep.subr.bf16.mxu1 %v333_v0 }
  0x1c   :  { %280 = vmatpush3.bf16.msra.mxu1 %v303_v6 }
  0x1d   :  { %281 = vmatprep.subr.bf16.mxu1 %v333_v0 }
  0x20   :  { %282 = vmatpush3.bf16.msra.mxu1 %v304_v7 }
  0x21   :  { %283 = vmatprep.subr.bf16.mxu1 %v333_v0 }
  0x24   :  { %284 = vmatpush3.bf16.msra.mxu1 %v305_v8 }
  0x25   :  { %285 = vmatprep.subr.bf16.mxu1 %v333_v0 }
  0x28   :  { %286 = vmatpush3.bf16.msra.mxu1 %v306_v9 }
  0x29   :  { %287 = vmatprep.subr.bf16.mxu1 %v333_v0 }
  0x2c   :  { %288 = vmatpush3.bf16.msra.mxu1 %v307_v10 }
  0xd3   :  { %v101_v12 = vpop.f32.mrf.mxu0 }
  0xd4   :  { %v102_v14 = vadd.f32 %v243_v11, %v101_v12 }
  0xd5   :  { %v271_v13 = vpop.f32.mrf.mxu0 }
  0xd6   :  { %v108_v18 = vmax.f32 %v102_v14, 0.0 }
  0xd7   :  { %v104_v15 = vpop.f32.mrf.mxu0 }
  0xd8   :  { %v105_v16 = vadd.f32 %v243_v11, %v104_v15 }
  0xd9   :  { %v272_v17 = vpop.f32.mrf.mxu0 }
  0xda   :  { %v109_v19 = vmax.f32 %v105_v16, 0.0 }
  0xdc   :  { %v112_v20 = vpack.c.bf16 %v109_v19, %v108_v18 }
  0xde   :  { %290 = vmatmul.mubr.bf16.vlgmr.msra.gmra.mxu1 %v112_v20 }
 0x19e   :  { %v211_v22 = vpop.f32.mrf.mxu1 }
 0x19f   :  { %v234_v23 = vadd.f32 %v255_v21, %v211_v22 }
 0x1a0   :  { %v291_v24 = vpop.f32.mrf.mxu1 }
 0x1a1   :  { %236 = vst [vmem:[%s391_s5] sm:$0xff] %v234_v23 }
 0x1a2   :  { %v214_v25 = vpop.f32.mrf.mxu1 }
 0x1a3   :  { %v235_v26 = vadd.f32 %v255_v21, %v214_v25 }
 0x1a4   :  { %v292_v27 = vpop.f32.mrf.mxu1 }
 0x1a5   :  { %237 = vst [vmem:[%s391_s5 + $0x8] sm:$0xff] %v235_v26 }
 0x1a6   :  { %242 = vsyncpa [#allocation4], 1 }

</bundles_post_ra>
